<compile_context>
chip_gen: v6e
topology: v6e:2x2x1
jax: 0.10.0
libtpu: 0.0.40
codegen_flags: <defaults>
</compile_context>

<pallas_src>
import jax
import jax.numpy as jnp
from jax import lax
from jax.experimental import pallas as pl
from jax.experimental.pallas import tpu as pltpu

# ImageNet-from-[-1,1] constants, identical to the PyTorch module's buffers.
_MEAN = (-0.03, -0.088, -0.188)
_STD = (0.458, 0.448, 0.45)

_LANE_TILE_CAP = 8192            # lanes per block (multiple of 128)
_TARGET_BLOCK_BYTES = 4 << 20    # ~4 MiB block; double-buffered in+out = 16 MiB
_MIN_BLOCK_BYTES = 128 << 10     # keep several grid steps even for tiny inputs
_VMEM_LIMIT_BYTES = 32 << 20     # explicit headroom (v5e scoped default is 16 MiB)


def _choose_tiles(rows, lanes, elem_bytes):
    """Fixed (row_tile, lane_tile); grid uses pl.cdiv, tail blocks are masked."""
    # Dtype-aware sublane quantum: 8 rows f32, 16 bf16, 32 int8/fp8.
    sub_q = max(8, 32 // max(1, elem_bytes))
    # Multiple of lcm(sub_q, 3): every block starts at a channel-0 row, so the
    # per-row channel pattern is identical in every block.
    row_q = 3 * sub_q

    # Lane tile: full extent when small (always legal), else a fixed multiple
    # of 128 (tails masked).
    lane_tile = lanes if lanes <= _LANE_TILE_CAP else _LANE_TILE_CAP

    # Block-byte target: ~4 MiB, scaled down for small tensors so the grid
    # still has >= ~8 steps (pipelining + megacore sharding).
    total_bytes = rows * lanes * elem_bytes
    target = min(_TARGET_BLOCK_BYTES, max(total_bytes // 8, _MIN_BLOCK_BYTES))

    if rows <= row_q:
        row_tile = rows                      # full extent; rows = 3N (mult. of 3)
    else:
        row_tile = max(row_q,
                       (target // (lane_tile * elem_bytes)) // row_q * row_q)
        if row_tile >= rows:
            row_tile = rows                  # full extent (still mult. of 3)
    return row_tile, lane_tile


def _make_kernel(row_tile):
    m0, m1, m2 = (float(v) for v in _MEAN)
    s0, s1, s2 = (float(v) for v in _STD)

    def kernel(x_ref, o_ref):
        # Every block starts at a channel-0 row (row_tile % 3 == 0, or the block
        # is the full row extent = 3N), so the channel of local row r is r % 3.
        # No program_id dependence: the whole pattern is a compile-time constant
        # the compiler can hoist out of the grid loop; even unhoisted it is free
        # VPU filler on an HBM-bound op.
        ch = lax.broadcasted_iota(jnp.int32, (row_tile, 1), 0) % 3
        mean = jnp.where(ch == 0, m0, jnp.where(ch == 1, m1, m2))
        std = jnp.where(ch == 0, s0, jnp.where(ch == 1, s1, s2))
        x = x_ref[...].astype(jnp.float32)
        # True division to match the module's (x - mean) / std as closely as
        # possible; the op is HBM-bound so the divide is hidden.
        o_ref[...] = ((x - mean) / std).astype(o_ref.dtype)

    return kernel


@jax.jit
def imagenet_normalize(x):
    """x: (N, 3, H, W) float. Returns (x - mean) / std, same shape/dtype."""
    n, c, h, w = x.shape
    assert c == 3, "ImagenetNormalize is defined for 3-channel inputs"

    rows, lanes = n * c, h * w
    x2d = x.reshape(rows, lanes)   # lane-dense 2D view: channel constant per row

    elem_bytes = jnp.dtype(x.dtype).itemsize
    row_tile, lane_tile = _choose_tiles(rows, lanes, elem_bytes)
    grid = (pl.cdiv(rows, row_tile), pl.cdiv(lanes, lane_tile))

    out2d = pl.pallas_call(
        _make_kernel(row_tile),
        out_shape=jax.ShapeDtypeStruct((rows, lanes), x.dtype),
        grid=grid,
        in_specs=[pl.BlockSpec((row_tile, lane_tile), lambda i, j: (i, j))],
        out_specs=pl.BlockSpec((row_tile, lane_tile), lambda i, j: (i, j)),
        input_output_aliases={0: 0},   # elementwise same-shape: allow in-place
        compiler_params=pltpu.CompilerParams(
            dimension_semantics=("parallel", "parallel"),
            vmem_limit_bytes=_VMEM_LIMIT_BYTES,
        ),
    )(x2d)

    return out2d.reshape(n, c, h, w)


def _reference(x):
    mean = jnp.asarray(_MEAN, jnp.float32).reshape(1, 3, 1, 1)
    std = jnp.asarray(_STD, jnp.float32).reshape(1, 3, 1, 1)
    return ((x.astype(jnp.float32) - mean) / std).astype(x.dtype)


if __name__ == "__main__":
    key = jax.random.PRNGKey(0)

    # (shape, dtype, tolerance): small primary case plus cases exercising the
    # masked-tail lane/row tiling paths and the dtype-aware quantum.
    checks = [
        ((2, 3, 16, 16), jnp.float32, 1e-6),    # tiny: single full-extent block
        ((2, 3, 224, 224), jnp.float32, 1e-6),  # lane-tiled path w/ masked tail
        ((17, 3, 64, 64), jnp.float32, 1e-6),   # row-tiled path w/ masked tail
        ((2, 3, 16, 16), jnp.bfloat16, 1e-2),   # bf16: 16-row sublane quantum
    ]

    for i, (shape, dtype, tol) in enumerate(checks):
        k = jax.random.fold_in(key, i)
        x = jax.random.uniform(
            k, shape, dtype=jnp.float32, minval=-1.0, maxval=1.0
        ).astype(dtype)

        expected = _reference(x)
        out = jax.block_until_ready(imagenet_normalize(x))

        assert out.shape == x.shape and out.dtype == x.dtype, shape
        assert jnp.allclose(
            out.astype(jnp.float32), expected.astype(jnp.float32),
            rtol=tol, atol=tol,
        ), f"mismatch at shape {shape} dtype {dtype}"

    print("KERNEL_OK")
</pallas_src>

<mosaic_0001>
module attributes {stable_mosaic.version = 11 : i64} {
  func.func @kernel(%arg0: i32, %arg1: i32, %arg2: memref<6x256xf32, #tpu.memory_space<vmem>>, %arg3: memref<6x256xf32, #tpu.memory_space<vmem>>) attributes {dimension_semantics = [#tpu.dimension_semantics<parallel>, #tpu.dimension_semantics<parallel>], iteration_bounds = array<i64: 1, 1>, scalar_prefetch = 0 : i64, scratch_operands = 0 : i64, tpu.core_type = #tpu.core_type<tc>, window_params = [{transform_indices = @transform_0, window_bounds = array<i64: 6, 256>}, {transform_indices = @transform_1, window_bounds = array<i64: 6, 256>}]} {
    %0 = tpu.iota {dimensions = array<i32: 0>} : vector<6x1xi32>
    %c3_i32 = arith.constant 3 : i32
    %c0_i32 = arith.constant 0 : i32
    %1 = arith.cmpi eq, %c3_i32, %c0_i32 : i32
    %c1_i32 = arith.constant 1 : i32
    %2 = arith.select %1, %c1_i32, %c3_i32 : i32
    %3 = vector.broadcast %2 : i32 to vector<6x1xi32>
    %4 = arith.remsi %0, %3 : vector<6x1xi32>
    %c0_i32_0 = arith.constant 0 : i32
    %5 = vector.broadcast %c0_i32_0 : i32 to vector<6x1xi32>
    %6 = arith.cmpi ne, %4, %5 : vector<6x1xi32>
    %c0_i32_1 = arith.constant 0 : i32
    %7 = vector.broadcast %c0_i32_1 : i32 to vector<6x1xi32>
    %8 = arith.cmpi slt, %4, %7 : vector<6x1xi32>
    %c0_i32_2 = arith.constant 0 : i32
    %9 = arith.cmpi slt, %2, %c0_i32_2 : i32
    %10 = vector.broadcast %9 : i1 to vector<6x1xi1>
    %11 = vector.broadcast %10 : vector<6x1xi1> to vector<6x1xi1>
    %12 = arith.xori %8, %11 : vector<6x1xi1>
    %13 = arith.andi %12, %6 : vector<6x1xi1>
    %14 = vector.broadcast %2 : i32 to vector<6x1xi32>
    %15 = arith.addi %4, %14 : vector<6x1xi32>
    %16 = arith.select %13, %15, %4 : vector<6x1xi1>, vector<6x1xi32>
    %c0_i32_3 = arith.constant 0 : i32
    %17 = vector.broadcast %c0_i32_3 : i32 to vector<6x1xi32>
    %18 = arith.cmpi eq, %16, %17 : vector<6x1xi32>
    %c1_i32_4 = arith.constant 1 : i32
    %19 = vector.broadcast %c1_i32_4 : i32 to vector<6x1xi32>
    %20 = arith.cmpi eq, %16, %19 : vector<6x1xi32>
    %cst = arith.constant -0.0879999995 : f32
    %cst_5 = arith.constant -1.880000e-01 : f32
    %21 = vector.broadcast %cst : f32 to vector<6x1xf32>
    %22 = vector.broadcast %cst_5 : f32 to vector<6x1xf32>
    %23 = arith.select %20, %21, %22 : vector<6x1xi1>, vector<6x1xf32>
    %cst_6 = arith.constant -3.000000e-02 : f32
    %24 = vector.broadcast %cst_6 : f32 to vector<6x1xf32>
    %25 = arith.select %18, %24, %23 : vector<6x1xi1>, vector<6x1xf32>
    %c0_i32_7 = arith.constant 0 : i32
    %26 = vector.broadcast %c0_i32_7 : i32 to vector<6x1xi32>
    %27 = arith.cmpi eq, %16, %26 : vector<6x1xi32>
    %c1_i32_8 = arith.constant 1 : i32
    %28 = vector.broadcast %c1_i32_8 : i32 to vector<6x1xi32>
    %29 = arith.cmpi eq, %16, %28 : vector<6x1xi32>
    %cst_9 = arith.constant 4.480000e-01 : f32
    %cst_10 = arith.constant 4.500000e-01 : f32
    %30 = vector.broadcast %cst_9 : f32 to vector<6x1xf32>
    %31 = vector.broadcast %cst_10 : f32 to vector<6x1xf32>
    %32 = arith.select %29, %30, %31 : vector<6x1xi1>, vector<6x1xf32>
    %cst_11 = arith.constant 4.580000e-01 : f32
    %33 = vector.broadcast %cst_11 : f32 to vector<6x1xf32>
    %34 = arith.select %27, %33, %32 : vector<6x1xi1>, vector<6x1xf32>
    %c0 = arith.constant 0 : index
    %c0_12 = arith.constant 0 : index
    %35 = vector.load %arg2[%c0, %c0_12] : memref<6x256xf32, #tpu.memory_space<vmem>>, vector<6x256xf32>
    %36 = vector.broadcast %25 : vector<6x1xf32> to vector<6x256xf32>
    %37 = arith.subf %35, %36 : vector<6x256xf32>
    %38 = vector.broadcast %34 : vector<6x1xf32> to vector<6x256xf32>
    %39 = arith.divf %37, %38 : vector<6x256xf32>
    %c0_13 = arith.constant 0 : index
    %c0_14 = arith.constant 0 : index
    %40 = vector.load %arg3[%c0_13, %c0_14] : memref<6x256xf32, #tpu.memory_space<vmem>>, vector<6x256xf32>
    tpu.vector_store %arg3[%c0_13, %c0_14], %39 {strides = array<i32>} : memref<6x256xf32, #tpu.memory_space<vmem>>, vector<6x256xf32>,
    return
  }
  func.func @transform_0(%arg0: i32, %arg1: i32) -> (i32, i32) {
    %c0_i32 = arith.constant 0 : i32
    return %arg0, %arg1 : i32, i32
  }
  func.func @transform_1(%arg0: i32, %arg1: i32) -> (i32, i32) {
    %c0_i32 = arith.constant 0 : i32
    return %arg0, %arg1 : i32, i32
  }
}

</mosaic_0001>

<bundles_post_ra>
// kernel: imagenet_normalize.1
= control target key start
LH: loop header
LB: loop body
LE: loop exit
PB: predicated region body
PF: predicated region fallthrough
CT: control target
= control target key end

     0   :  { %v8_v0 = vlaneseq  ;;  %v51_v9 = vmov 0.45   ;;  %v52_v12 = vmov -0.188   ;;  %s79_s0 = inlined_call_operand.vmem [shape: f32[6,256], index: 0, kind: input, shape index: {}, may-alias: {0,1}]   ;;  %s80_s1 = inlined_call_operand.vmem [shape: f32[6,256], index: 1, kind: output, shape index: {}, may-alias: {0,1}]  }
   0x1   :  { %v32_v15 = vld [vmem:[%s79_s0] sm:$0x3f]  ;;  %v33_v16 = vld [vmem:[%s79_s0 + $0x8] sm:$0x3f] }
   0x2   :  { %v9_v1 = vshrl.u32 %v8_v0, 7 }
   0x4   :  { %v63_v2 = vmul.u32.u64.low 2863311531, %v9_v1  ;;  %v64_v3 = vmul.u32.u64.high 2863311531, %v9_v1, %v63_v2 }
   0x6   :  { %v16_v4 = vshrl.u32 %v64_v3, 1 }
   0x8   :  { %v17_v5 = vmul.u32 3, %v16_v4 }
   0xa   :  { %v18_v6 = vsub.s32 %v9_v1, %v17_v5 }
   0xc   :  { %vm21_vm0 = vcmp.ne.s32.totalorder %v18_v6, 0  ;;  %vm22_vm1 = vcmp.lt.s32.totalorder %v18_v6, 0  ;;  %v24_v7 = vadd.s32 3, %v18_v6 }
   0xd   :  { %vm23_vm2 = vmand %vm22_vm1, %vm21_vm0 }
   0xe   :  { %v25_v8 = vsel %vm23_vm2, %v24_v7, %v18_v6 }
   0xf   :  { %vm26_vm3 = vcmp.eq.s32.totalorder %v25_v8, 0  ;;  %vm27_vm4 = vcmp.eq.s32.totalorder %v25_v8, 1 }
  0x10   :  { %v30_v10 = vsel %vm27_vm4, 0.448, %v51_v9  ;;  %v28_v13 = vsel %vm27_vm4, -0.088, %v52_v12 }
  0x11   :  { %v31_v11 = vsel %vm26_vm3, 0.458, %v30_v10  ;;  %v29_v14 = vsel %vm26_vm3, -0.03, %v28_v13 }
  0x12   :  { %49 = vrcp.f32 %v31_v11  ;;  %v34_v17 = vsub.f32 %v32_v15, %v29_v14  ;;  %v35_v18 = vsub.f32 %v33_v16, %v29_v14 }
  0x1f   :  { %v50_v19 = vpop.eup %49 }
  0x20   :  { %v37_v20 = vmul.f32 %v50_v19, %v34_v17  ;;  %v38_v21 = vmul.f32 %v50_v19, %v35_v18 }
  0x22   :  { %39 = vst [vmem:[%s80_s1] sm:$0x3f] %v37_v20  ;;  %40 = vst [vmem:[%s80_s1 + $0x8] sm:$0x3f] %v38_v21 }

</bundles_post_ra>
